<compile_context>
chip_gen: v7x
topology: tpu7x:2x2x1
jax: 0.10.0
libtpu: 0.0.40
codegen_flags: <defaults>
</compile_context>

<pallas_src>
import functools
import math

import jax
import jax.numpy as jnp
from jax.experimental import pallas as pl
from jax.experimental.pallas import tpu as pltpu

_LANE = 128
_BLOCK_BUDGET_BYTES = 12 * 1024 * 1024   # all streamed inputs, per grid step
_NUM_CHUNKS = 2                          # leading "parallel" axis (v7x: 2 TCs)


def _round_up(x, m):
    return ((x + m - 1) // m) * m


def _padded_row_bytes(s, l, dtype):
    # Conservative VMEM footprint of one leading-index slice (sublane/lane padded).
    itemsize = jnp.dtype(dtype).itemsize
    sublane = max(1, 32 // itemsize)     # f32: 8, bf16: 16, int8: 32
    return _round_up(max(s, 1), sublane) * _round_up(max(l, 1), _LANE) * itemsize


def _vmem_limit_bytes():
    # Generation-aware scoped-VMEM limit (v5e/v6e: 128 MiB physical, v7x: 64 MiB).
    try:
        cap = pltpu.get_tpu_info().vmem_capacity_bytes
        return int(max(32 << 20, min(cap // 2, 64 << 20)))
    except Exception:
        return 32 << 20


def _make_kernel(loss_type, with_weight, nb, rem, exact_grid):
    if loss_type not in ("l1", "l2"):
        raise ValueError(f"unsupported loss_type: {loss_type}")

    def kernel(*refs):
        if with_weight:
            p_ref, t_ref, w_ref, out_ref, acc_ref = refs
        else:
            p_ref, t_ref, out_ref, acc_ref = refs

        i = pl.program_id(1)
        steps = pl.num_programs(1)

        @pl.when(i == 0)
        def _():
            acc_ref[...] = jnp.zeros_like(acc_ref)

        # Native-dtype DMA, f32 upcast in-kernel before any arithmetic.
        d = p_ref[...].astype(jnp.float32) - t_ref[...].astype(jnp.float32)
        loss = d * d if loss_type == "l2" else jnp.abs(d)
        if with_weight:
            loss = loss * w_ref[...].astype(jnp.float32)

        blk = pl.program_id(0) * steps + i   # logical row-block index

        # Hot loop: full-vreg adds over the leading axis only; the expensive
        # cross-sublane/lane reduce happens once in the finalize branch.
        if rem == 0:
            if exact_grid:
                acc_ref[...] += jnp.sum(loss, axis=0)
            else:
                @pl.when(blk < nb)                 # skip over-coverage blocks
                def _():
                    acc_ref[...] += jnp.sum(loss, axis=0)
        else:
            @pl.when(blk < nb - 1)                 # full blocks
            def _():
                acc_ref[...] += jnp.sum(loss, axis=0)

            @pl.when(blk == nb - 1)                # ragged last block (static slice)
            def _():
                acc_ref[...] += jnp.sum(loss[:rem], axis=0)

        @pl.when(i == steps - 1)
        def _():
            out_ref[...] = jnp.reshape(jnp.sum(acc_ref[...]), (1, 1, 1))

    return kernel


def _classify_weight(weighted, pred_shape):
    """scalar -> fold into mean; per_sample -> tiny side input; full -> stream."""
    if jnp.ndim(weighted) == 0:
        return "scalar", None
    w = jnp.asarray(weighted)
    if w.size == 1:                       # single broadcast value == scalar
        return "scalar", w
    if w.ndim > len(pred_shape):
        return "full", w
    aligned = (1,) * (len(pred_shape) - w.ndim) + w.shape
    n_trail = min(2, len(pred_shape))
    if all(d == 1 for d in aligned[len(pred_shape) - n_trail:]):
        return "per_sample", w.reshape(aligned)
    return "full", w


@functools.partial(jax.jit, static_argnames=("loss_type",))
def weighted_loss(pred, target, weighted=1.0, loss_type="l2"):
    """Pallas TPU implementation of WeightedLoss.forward.

    pred, target: [batch_size, 2, traj_length] (any shape; fully reduced).
    weighted: scalar, or an array broadcastable to pred.shape.
    """
    assert pred.shape == target.shape, (pred.shape, target.shape)
    shape = pred.shape
    if len(shape) >= 3:
        B, S, L = math.prod(shape[:-2]), shape[-2], shape[-1]
    elif len(shape) == 2:
        B, S, L = 1, shape[0], shape[1]
    elif len(shape) == 1:
        B, S, L = 1, 1, shape[0]
    else:
        B, S, L = 1, 1, 1
    n = max(1, B * S * L)

    # Free reshapes: only leading dims are collapsed; trailing (tiled) dims and
    # dtypes are untouched, so no HBM relayout/copy happens before the kernel.
    p3 = pred.reshape(B, S, L)
    t3 = target.reshape(B, S, L)

    mode, w_arr = _classify_weight(weighted, shape)

    inputs = [p3, t3]
    row_bytes = [_padded_row_bytes(S, L, pred.dtype),
                 _padded_row_bytes(S, L, target.dtype)]
    w_tail = None
    if mode == "per_sample":
        # Tiny (B, S, 1) side input; broadcast along lanes inside the kernel.
        w3 = jnp.broadcast_to(w_arr, shape[:-2] + (S, 1)).astype(jnp.float32)
        w3 = w3.reshape(B, S, 1)
        inputs.append(w3)
        row_bytes.append(_padded_row_bytes(S, 1, jnp.float32))
        w_tail = (S, 1)
    elif mode == "full":
        # Genuinely element-wise weight: has to be streamed at full size.
        w3 = jnp.broadcast_to(w_arr, shape).reshape(B, S, L)
        inputs.append(w3)
        row_bytes.append(_padded_row_bytes(S, L, w3.dtype))
        w_tail = (S, L)

    # Block sizing: as many rows as fit the per-step VMEM budget so the
    # pipeline is HBM-bound, not step-overhead bound.
    per_row = sum(row_bytes)
    tile_b = max(1, min(B, _BLOCK_BUDGET_BYTES // per_row))
    # TODO(synk): if a single (S, L) slice alone exceeds the budget (huge
    # trailing dims / 2-D inputs), a second grid axis over S or L is needed;
    # the module's [batch, 2, traj] shapes never hit this.

    nb = pl.cdiv(B, tile_b)              # number of real row blocks
    rem = B % tile_b                     # rows in the ragged last block
    num_chunks = _NUM_CHUNKS if nb >= _NUM_CHUNKS else 1
    steps = pl.cdiv(nb, num_chunks)
    exact_grid = (num_chunks * steps == nb)

    def data_map(c, i):
        return (jnp.minimum(c * steps + i, nb - 1), 0, 0)

    in_specs = [pl.BlockSpec((tile_b, S, L), data_map),
                pl.BlockSpec((tile_b, S, L), data_map)]
    if w_tail is not None:
        in_specs.append(pl.BlockSpec((tile_b,) + w_tail, data_map))
    out_specs = pl.BlockSpec((1, 1, 1), lambda c, i: (c, 0, 0))

    cost = pl.CostEstimate(
        flops=(4 if w_tail is not None else 3) * n,
        transcendentals=0,
        bytes_accessed=sum(int(x.size) * x.dtype.itemsize for x in inputs)
        + 4 * num_chunks,
    )

    partials = pl.pallas_call(
        _make_kernel(loss_type, w_tail is not None, nb, rem, exact_grid),
        out_shape=jax.ShapeDtypeStruct((num_chunks, 1, 1), jnp.float32),
        grid=(num_chunks, steps),
        in_specs=in_specs,
        out_specs=out_specs,
        scratch_shapes=[pltpu.VMEM((S, L), jnp.float32)],
        compiler_params=pltpu.CompilerParams(
            dimension_semantics=("parallel", "arbitrary"),
            vmem_limit_bytes=_vmem_limit_bytes()),
        cost_estimate=cost,
    )(*inputs)

    mean = jnp.sum(partials) / jnp.float32(n)
    if mode == "scalar":
        mean = mean * jnp.asarray(weighted, jnp.float32).reshape(())
    return mean


def reference_forward(pred, target, weighted=1.0, loss_type="l2"):
    """Pure-JAX reference of the PyTorch forward (f32 accumulation)."""
    d = pred.astype(jnp.float32) - target.astype(jnp.float32)
    loss = d * d if loss_type == "l2" else jnp.abs(d)
    return (loss * jnp.asarray(weighted, jnp.float32)).mean()


if __name__ == "__main__":
    key = jax.random.PRNGKey(0)
    k1, k2, k3, k4, k5, k6 = jax.random.split(key, 6)

    # Shapes consistent with the module: pred/target are [batch_size, 2, traj_length].
    B, T = 4, 16
    pred = jax.random.normal(k1, (B, 2, T), dtype=jnp.float32)
    target = jax.random.normal(k2, (B, 2, T), dtype=jnp.float32)

    # 1) default scalar weight, L2 (WeightedL2 behaviour)
    out = jax.block_until_ready(weighted_loss(pred, target))
    ref = reference_forward(pred, target)
    assert jnp.allclose(out, ref, rtol=1e-5, atol=1e-6), (out, ref)

    # 2) scalar weight != 1, L1 (WeightedL1 behaviour)
    out = jax.block_until_ready(weighted_loss(pred, target, 0.25, loss_type="l1"))
    ref = reference_forward(pred, target, 0.25, loss_type="l1")
    assert jnp.allclose(out, ref, rtol=1e-5, atol=1e-6), (out, ref)

    # 3) per-sample tensor weight + non-lane-aligned trailing dim
    pred2 = jax.random.normal(k3, (3, 2, 37), dtype=jnp.float32)
    target2 = jax.random.normal(k4, (3, 2, 37), dtype=jnp.float32)
    w = jax.random.uniform(k5, (3, 1, 1), dtype=jnp.float32)
    out = jax.block_until_ready(weighted_loss(pred2, target2, w))
    ref = reference_forward(pred2, target2, w)
    assert jnp.allclose(out, ref, rtol=1e-5, atol=1e-6), (out, ref)

    # 4) fully element-wise weight (full-stream path)
    w_full = jax.random.uniform(k6, (3, 2, 37), dtype=jnp.float32)
    out = jax.block_until_ready(weighted_loss(pred2, target2, w_full))
    ref = reference_forward(pred2, target2, w_full)
    assert jnp.allclose(out, ref, rtol=1e-5, atol=1e-6), (out, ref)

    # 5) bf16 inputs streamed in native dtype (in-kernel f32 upcast)
    out = jax.block_until_ready(
        weighted_loss(pred.astype(jnp.bfloat16), target.astype(jnp.bfloat16)))
    ref = reference_forward(pred.astype(jnp.bfloat16), target.astype(jnp.bfloat16))
    assert jnp.allclose(out, ref, rtol=1e-5, atol=1e-6), (out, ref)

    print("KERNEL_OK")
</pallas_src>

<mosaic_0001>
module attributes {stable_mosaic.version = 11 : i64} {
  func.func @kernel(%arg0: i32, %arg1: i32, %arg2: memref<4x2x16xf32, #tpu.memory_space<vmem>>, %arg3: memref<4x2x16xf32, #tpu.memory_space<vmem>>, %arg4: memref<1x1x1xf32, #tpu.memory_space<vmem>>, %arg5: memref<2x16xf32, #tpu.memory_space<vmem>>) attributes {dimension_semantics = [#tpu.dimension_semantics<parallel>, #tpu.dimension_semantics<arbitrary>], iteration_bounds = array<i64: 1, 1>, scalar_prefetch = 0 : i64, scratch_operands = 1 : i64, tpu.core_type = #tpu.core_type<tc>, window_params = [{transform_indices = @transform_0, window_bounds = array<i64: 4, 2, 16>}, {transform_indices = @transform_1, window_bounds = array<i64: 4, 2, 16>}, {transform_indices = @transform_2, window_bounds = array<i64: 1, 1, 1>}]} {
    %c0_i32 = arith.constant 0 : i32
    %0 = arith.cmpi eq, %arg1, %c0_i32 : i32
    %1 = arith.extui %0 : i1 to i32
    %c0_i32_0 = arith.constant 0 : i32
    %2 = arith.cmpi ne, %1, %c0_i32_0 : i32
    scf.if %2 {
      %cst_12 = arith.constant 0.000000e+00 : f32
      %14 = vector.broadcast %cst_12 : f32 to vector<2x16xf32>
      %c0_13 = arith.constant 0 : index
      %c0_14 = arith.constant 0 : index
      %15 = vector.load %arg5[%c0_13, %c0_14] : memref<2x16xf32, #tpu.memory_space<vmem>>, vector<2x16xf32>
      tpu.vector_store %arg5[%c0_13, %c0_14], %14 {strides = array<i32>} : memref<2x16xf32, #tpu.memory_space<vmem>>, vector<2x16xf32>,
    } else {
    }
    %c0 = arith.constant 0 : index
    %c0_1 = arith.constant 0 : index
    %c0_2 = arith.constant 0 : index
    %3 = vector.load %arg2[%c0, %c0_1, %c0_2] : memref<4x2x16xf32, #tpu.memory_space<vmem>>, vector<4x2x16xf32>
    %c0_3 = arith.constant 0 : index
    %c0_4 = arith.constant 0 : index
    %c0_5 = arith.constant 0 : index
    %4 = vector.load %arg3[%c0_3, %c0_4, %c0_5] : memref<4x2x16xf32, #tpu.memory_space<vmem>>, vector<4x2x16xf32>
    %5 = arith.subf %3, %4 : vector<4x2x16xf32>
    %6 = arith.mulf %5, %5 : vector<4x2x16xf32>
    %c0_6 = arith.constant 0 : index
    %c0_7 = arith.constant 0 : index
    %7 = vector.load %arg5[%c0_6, %c0_7] : memref<2x16xf32, #tpu.memory_space<vmem>>, vector<2x16xf32>
    %cst = arith.constant dense<0.000000e+00> : vector<2x16xf32>
    %8 = vector.multi_reduction <add>, %6, %cst [0] : vector<4x2x16xf32> to vector<2x16xf32>
    %9 = arith.addf %7, %8 : vector<2x16xf32>
    %c0_8 = arith.constant 0 : index
    %c0_9 = arith.constant 0 : index
    %10 = vector.load %arg5[%c0_8, %c0_9] : memref<2x16xf32, #tpu.memory_space<vmem>>, vector<2x16xf32>
    tpu.vector_store %arg5[%c0_8, %c0_9], %9 {strides = array<i32>} : memref<2x16xf32, #tpu.memory_space<vmem>>, vector<2x16xf32>,
    %c0_i32_10 = arith.constant 0 : i32
    %11 = arith.cmpi eq, %arg1, %c0_i32_10 : i32
    %12 = arith.extui %11 : i1 to i32
    %c0_i32_11 = arith.constant 0 : i32
    %13 = arith.cmpi ne, %12, %c0_i32_11 : i32
    scf.if %13 {
      %c0_12 = arith.constant 0 : index
      %c0_13 = arith.constant 0 : index
      %14 = vector.load %arg5[%c0_12, %c0_13] : memref<2x16xf32, #tpu.memory_space<vmem>>, vector<2x16xf32>
      %15 = vector.shape_cast %14 : vector<2x16xf32> to vector<1x2x16xf32>
      %cst_14 = arith.constant dense<0.000000e+00> : vector<1xf32>
      %16 = vector.multi_reduction <add>, %15, %cst_14 [1, 2] : vector<1x2x16xf32> to vector<1xf32>
      %17 = vector.shape_cast %16 : vector<1xf32> to vector<1x1x1xf32>
      %18 = vector.extract %17[0, 0, 0] : f32 from vector<1x1x1xf32>
      %19 = vector.broadcast %18 : f32 to vector<1x1x1xf32>
      %c0_15 = arith.constant 0 : index
      %c0_16 = arith.constant 0 : index
      %c0_17 = arith.constant 0 : index
      %20 = vector.load %arg4[%c0_15, %c0_16, %c0_17] : memref<1x1x1xf32, #tpu.memory_space<vmem>>, vector<1x1x1xf32>
      tpu.vector_store %arg4[%c0_15, %c0_16, %c0_17], %19 {strides = array<i32>} : memref<1x1x1xf32, #tpu.memory_space<vmem>>, vector<1x1x1xf32>,
    } else {
    }
    return
  }
  func.func @transform_0(%arg0: i32, %arg1: i32) -> (i32, i32, i32) {
    %c1_i32 = arith.constant 1 : i32
    %0 = arith.muli %arg0, %c1_i32 : i32
    %1 = arith.addi %0, %arg1 : i32
    %c0_i32 = arith.constant 0 : i32
    %2 = arith.minsi %1, %c0_i32 : i32
    %c0_i32_0 = arith.constant 0 : i32
    %c0_i32_1 = arith.constant 0 : i32
    %c0_i32_2 = arith.constant 0 : i32
    return %2, %c0_i32_0, %c0_i32_1 : i32, i32, i32
  }
  func.func @transform_1(%arg0: i32, %arg1: i32) -> (i32, i32, i32) {
    %c1_i32 = arith.constant 1 : i32
    %0 = arith.muli %arg0, %c1_i32 : i32
    %1 = arith.addi %0, %arg1 : i32
    %c0_i32 = arith.constant 0 : i32
    %2 = arith.minsi %1, %c0_i32 : i32
    %c0_i32_0 = arith.constant 0 : i32
    %c0_i32_1 = arith.constant 0 : i32
    %c0_i32_2 = arith.constant 0 : i32
    return %2, %c0_i32_0, %c0_i32_1 : i32, i32, i32
  }
  func.func @transform_2(%arg0: i32, %arg1: i32) -> (i32, i32, i32) {
    %c0_i32 = arith.constant 0 : i32
    %c0_i32_0 = arith.constant 0 : i32
    %c0_i32_1 = arith.constant 0 : i32
    return %arg0, %c0_i32, %c0_i32_0 : i32, i32, i32
  }
}

</mosaic_0001>

<bundles_post_ra>
// kernel: weighted_loss.1
= control target key start
LH: loop header
LB: loop body
LE: loop exit
PB: predicated region body
PF: predicated region fallthrough
CT: control target
= control target key end

     0   :  { %7 = vsyncpa [#allocation4], 0  ;;  %s274_s0 = inlined_call_operand.hbm [shape: f32[4,2,16], index: 0, kind: input, shape index: {}]   ;;  %s275_s1 = inlined_call_operand.hbm [shape: f32[4,2,16], index: 1, kind: input, shape index: {}]   ;;  %s276_s2 = inlined_call_operand.hbm [shape: f32[1,1,1], index: 2, kind: output, shape index: {}]  }
   0x1   :  { %8 = vsyncpa [#allocation7], 0 }
   0x2   :  { %9 = vsyncpa [#allocation5], 0  ;;  %s210_s9 = smov [#allocation3]   ;;  %s138_s13 = scalar_lea.hbm %s274_s0, 128 }
   0x3   :  { %s21_s10 = sshll.u32 %s210_s9, 4  ;;  %p139_p0 = scmp.ne.s32.totalorder %s274_s0, %s138_s13  ;;  %s22_s10 = int_to_ptr.vmem [resolvable:$true] %s21_s10 }
   0x4   :  { %p142_p1 = scmp.lt.u32.totalorder %s138_s13, %s274_s0 }
   0x6   :  { %p144_p2 = pnand %p142_p1, %p139_p0 }
   0x8   :  { %147 = shalt.err (!%p144_p2)
}
   0x9   :  { %s148_s18 = scalar_lea.vmem %s22_s10, 128  ;;  %p153_p4 = scmp.lt.s32.totalorder %s22_s10, %s22_s10 }
   0xa   :  { %p149_p3 = scmp.ne.s32.totalorder %s22_s10, %s148_s18  ;;  %p154_p5 = scmp.lt.s32.totalorder %s148_s18, %s148_s18 }
   0xc   :  { %p155_p6 = por %p154_p5, %p153_p4 }
   0xe   :  { %p156_p7 = pnand %p155_p6, %p149_p3 }
  0x10   :  { %159 = shalt.err (!%p156_p7)
}
  0x11   :  { %s211_s19 = smov 32   ;;  %s212_s20 = smov 2  }
  0x12   :  { %27 = dma.hbm_to_vmem [thread:$0]  %s274_s0, 128, %s22_s10, [#allocation4], %s211_s19, %s211_s19, %s212_s20  }
  0x13   :  { %s213_s23 = smov [#allocation6]   ;;  %s160_s27 = scalar_lea.hbm %s275_s1, 128 }
  0x14   :  { %s39_s24 = sshll.u32 %s213_s23, 4  ;;  %p161_p8 = scmp.ne.s32.totalorder %s275_s1, %s160_s27  ;;  %s40_s24 = int_to_ptr.vmem [resolvable:$true] %s39_s24 }
  0x15   :  { %p164_p9 = scmp.lt.u32.totalorder %s160_s27, %s275_s1 }
  0x17   :  { %p166_p10 = pnand %p164_p9, %p161_p8 }
  0x19   :  { %169 = shalt.err (!%p166_p10)
}
  0x1a   :  { %s170_s4 = scalar_lea.vmem %s40_s24, 128  ;;  %p175_p12 = scmp.lt.s32.totalorder %s40_s24, %s40_s24 }
  0x1b   :  { %p171_p11 = scmp.ne.s32.totalorder %s40_s24, %s170_s4  ;;  %p176_p13 = scmp.lt.s32.totalorder %s170_s4, %s170_s4 }
  0x1d   :  { %p177_p0 = por %p176_p13, %p175_p12 }
  0x1f   :  { %p178_p1 = pnand %p177_p0, %p171_p11 }
  0x21   :  { %181 = shalt.err (!%p178_p1)
}
  0x22   :  { %45 = dma.hbm_to_vmem [thread:$0]  %s275_s1, 128, %s40_s24, [#allocation7], %s211_s19, %s211_s19, %s212_s20  }
  0x23   :  { %204 = dma.done.wait [#allocation4], 128  }
  0x24   :  { %205 = vsyncadd [#allocation4], 4294967168 }
  0x25   :  { %206 = dma.done.wait [#allocation7], 128  }
  0x26   :  { %207 = vsyncadd [#allocation7], 4294967168  ;;  %vm64_vm0 = vcmask 123904   ;;  %v214_v0 = vmov 0.0   ;;  %v66_v1 = vld [vmem:[#allocation3] sm:$0x3] }
  0x27   :  { %65 = vst.msk [vmem:[#allocation2] sm:$0x3] %vm64_vm0, %v214_v0  ;;  %v67_v2 = vld [vmem:[#allocation3 + $0x2] sm:$0x3]  ;;  %v68_v3 = vld [vmem:[#allocation3 + $0x4] sm:$0x3] }
  0x28   :  { %v69_v4 = vld [vmem:[#allocation3 + $0x6] sm:$0x3]  ;;  %v70_v5 = vld [vmem:[#allocation6] sm:$0x3]  ;;  %v71_v6 = vld [vmem:[#allocation6 + $0x2] sm:$0x3] }
  0x29   :  { %v72_v7 = vld [vmem:[#allocation6 + $0x4] sm:$0x3]  ;;  %v73_v8 = vld [vmem:[#allocation6 + $0x6] sm:$0x3]  ;;  %v74_v9 = vsub.f32 %v66_v1, %v70_v5  ;;  %v75_v10 = vsub.f32 %v67_v2, %v71_v6  ;;  %s215_s1 = smov [#allocation8]   ;;  %vm108_vm1 = vcmask 0  }
  0x2a   :  { %v76_v11 = vsub.f32 %v68_v3, %v72_v7  ;;  %v77_v12 = vsub.f32 %v69_v4, %v73_v8  ;;  %s116_s6 = sshll.u32 %s215_s1, 4  ;;  %s117_s6 = int_to_ptr.vmem [resolvable:$true] %s116_s6 }
  0x2b   :  { %v78_v13 = vmul.f32 %v74_v9, %v74_v9  ;;  %v79_v14 = vmul.f32 %v75_v10, %v75_v10  ;;  %s182_s8 = scalar_lea.vmem %s117_s6, 16  ;;  %s186_s9 = scalar_lea.vmem %s117_s6, 32 }
  0x2c   :  { %v80_v15 = vmul.f32 %v76_v11, %v76_v11  ;;  %v81_v16 = vmul.f32 %v77_v12, %v77_v12  ;;  %p183_p2 = scmp.ne.s32.totalorder %s117_s6, %s182_s8  ;;  %p187_p3 = scmp.lt.s32.totalorder %s117_s6, %s117_s6 }
  0x2d   :  { %v84_v17 = vsel %vm64_vm0, %v78_v13, 0.0  ;;  %v85_v18 = vsel %vm64_vm0, %v79_v14, 0.0  ;;  %p188_p4 = scmp.lt.s32.totalorder %s186_s9, %s182_s8 }
  0x2e   :  { %v86_v19 = vadd.f32 %v85_v18, %v84_v17  ;;  %v87_v20 = vsel %vm64_vm0, %v80_v15, 0.0  ;;  %v89_v21 = vsel %vm64_vm0, %v81_v16, 0.0  ;;  %v82_v23 = vld [vmem:[#allocation2] sm:$0x3] }
  0x2f   :  { %p189_p5 = por %p188_p4, %p187_p3 }
  0x30   :  { %v88_v22 = vadd.f32 %v87_v20, %v86_v19 }
  0x31   :  { %p190_p6 = pnand %p189_p5, %p183_p2 }
  0x32   :  { %v90_v24 = vadd.f32 %v89_v21, %v88_v22 }
  0x34   :  { %v91_v25 = vadd.f32 %v90_v24, %v82_v23 }
  0x36   :  { %92 = vst.msk [vmem:[#allocation2] sm:$0x3] %vm64_vm0, %v91_v25 }
  0x3d   :  { %v96_v26 = vld [vmem:[#allocation2] sm:$0x3] }
  0x3e   :  { %v97_v27 = vsel %vm64_vm0, %v96_v26, 0.0 }
  0x3f   :  { %98 = vadd.xlane.f32.xlu0 %v97_v27 }
  0xcc   :  { %v99_v28 = vpop.xlane.xlu0 %98 }
  0xcd   :  { %v100_v29 = vrot.slane %v99_v28, 4 }
  0xcf   :  { %v101_v30 = vadd.f32 %v100_v29, %v99_v28 }
  0xd1   :  { %v102_v31 = vrot.slane %v101_v30, 2 }
  0xd3   :  { %v103_v32 = vadd.f32 %v102_v31, %v101_v30 }
  0xd5   :  { %v104_v33 = vrot.slane %v103_v32, 1 }
  0xd7   :  { %v105_v34 = vadd.f32 %v104_v33, %v103_v32 }
  0xd9   :  { %130 = vpush %v105_v34 }
 0x10a   :  { %s131_s7 = spop %130 }
 0x10b   :  { %v107_v35 = vstv %s131_s7 }
 0x10c   :  { %109 = vst.msk [vmem:[#allocation8] sm:$0x1] %vm108_vm1, %v107_v35 }
 0x10d   :  { %193 = shalt.err (!%p190_p6)
}
 0x10e   :  { %s194_s12 = scalar_lea.hbm %s276_s2, 16 }
 0x10f   :  { %p195_p7 = scmp.ne.s32.totalorder %s276_s2, %s194_s12  ;;  %p198_p8 = scmp.lt.u32.totalorder %s194_s12, %s276_s2 }
 0x111   :  { %p200_p9 = pnand %p198_p8, %p195_p7 }
 0x113   :  { %203 = shalt.err (!%p200_p9)
}
 0x114   :  { %119 = dma.vmem_to_hbm [thread:$0]  %s117_s6, 16, %s276_s2, [#allocation5]  }
 0x115   :  { %208 = dma.done.wait [#allocation5], 16  }
 0x116   :  { %209 = vsyncadd [#allocation5], 4294967280 }
 0x117   :  { %123 = vsyncpa [#allocation4], 1 }
 0x118   :  { %124 = vsyncpa [#allocation7], 1 }
 0x119   :  { %125 = vsyncpa [#allocation5], 1 }

</bundles_post_ra>
